<compile_context>
chip_gen: v6e
topology: v6e:2x2x1
jax: 0.10.0
libtpu: 0.0.40
codegen_flags: <defaults>
</compile_context>

<pallas_src>
import math

import jax
import jax.numpy as jnp
from jax.experimental import pallas as pl
from jax.experimental.pallas import tpu as pltpu


def basic_block_kernel(xbf_ref, xf32_ref, a1_ref, a2_ref, b1_ref, b2_ref, out_ref):
    # xbf_ref : (H, L)     bf16  lane-dense activations, L = N*W*C (matmul operand)
    # xf32_ref: (H, L)     f32   same activations in f32 (residual path)
    # a1_ref  : (L, 3*L)   bf16  conv1 banded weights (BN1 scale folded), dy taps concat'd
    # a2_ref  : (L, 3*L)   bf16  conv2 banded weights (BN2 scale folded), dy taps concat'd
    # b1_ref  : (1, L)     f32   BN1 bias tiled across lanes
    # b2_ref  : (1, L)     f32   BN2 bias tiled across lanes
    # out_ref : (H, L)     f32
    H, L = out_ref.shape
    row = jax.lax.broadcasted_iota(jnp.int32, (H, L), 0)

    def conv3x3(lhs_bf, a_ref, bias):
        # One MXU push: (H, L) @ (L, 3L) -> (H, 3L), f32 accumulation.
        r = jnp.dot(lhs_bf, a_ref[...], preferred_element_type=jnp.float32)
        r0 = r[:, 0:L]          # dy = 0 tap: contributes to output row h from input row h-1
        r1 = r[:, L:2 * L]      # dy = 1 tap
        r2 = r[:, 2 * L:3 * L]  # dy = 2 tap: contributes to output row h from input row h+1
        dn = jnp.where(row == 0, 0.0, pltpu.roll(r0, shift=1, axis=0))
        up = jnp.where(row == H - 1, 0.0, pltpu.roll(r2, shift=H - 1, axis=0))
        return dn + r1 + up + bias

    # conv1 (+ folded BN1) + bias + ReLU
    mid = jnp.maximum(conv3x3(xbf_ref[...], a1_ref, b1_ref[...]), 0.0)
    # conv2 (+ folded BN2) + bias + f32 residual + ReLU
    out = conv3x3(mid.astype(jnp.bfloat16), a2_ref, b2_ref[...]) + xf32_ref[...]
    out_ref[...] = jnp.maximum(out, 0.0)


def _banded_tap(wt_dy, W):
    """wt_dy: (3, C, C) = [dx, cin, cout] -> (W*C, W*C) banded matrix with W-padding."""
    C = wt_dy.shape[1]
    acc = jnp.zeros((W * C, W * C), jnp.float32)
    for dx in range(3):
        acc = acc + jnp.kron(jnp.eye(W, k=1 - dx, dtype=jnp.float32), wt_dy[dx])
    return acc


def prepare_basic_block_params(w1_oihw, w2_oihw,
                               gamma1, beta1, mean1, var1,
                               gamma2, beta2, mean2, var2,
                               N, W, eps=1e-5):
    """Static-weight prep (cacheable across calls): BN fold, banding, batch block-diag,
    dy-tap concatenation, bias lane-tiling."""
    C = w1_oihw.shape[0]
    L = N * W * C

    # fold BN (eval mode) into scale / bias
    s1 = gamma1 / jnp.sqrt(var1 + eps)
    b1 = beta1 - mean1 * s1
    s2 = gamma2 / jnp.sqrt(var2 + eps)
    b2 = beta2 - mean2 * s2

    # (O,I,KH,KW) -> (dy, dx, cin, cout), BN scale folded into cout
    w1t = jnp.transpose(w1_oihw.astype(jnp.float32), (2, 3, 1, 0)) * s1
    w2t = jnp.transpose(w2_oihw.astype(jnp.float32), (2, 3, 1, 0)) * s2

    eye_n = jnp.eye(N, dtype=jnp.float32)

    def build(wt):
        taps = [jnp.kron(eye_n, _banded_tap(wt[dy], W)) for dy in range(3)]  # 3 x (L, L)
        return jnp.concatenate(taps, axis=1).astype(jnp.bfloat16)            # (L, 3L)

    a1 = build(w1t)
    a2 = build(w2t)

    # lane = n*W*C + w*C + c  ->  bias tiled N*W times over channel
    b1_lane = jnp.tile(b1.astype(jnp.float32), (N * W,)).reshape(1, L)
    b2_lane = jnp.tile(b2.astype(jnp.float32), (N * W,)).reshape(1, L)
    return a1, a2, b1_lane, b2_lane


def basic_block_forward(x_nchw, params):
    a1, a2, b1_lane, b2_lane = params
    N, C, H, W = x_nchw.shape
    L = N * W * C

    # NCHW -> (H, N*W*C) lane-dense slab (lane = n*W*C + w*C + c)
    x_lane = jnp.transpose(x_nchw, (2, 0, 3, 1)).reshape(H, L)   # f32, residual path
    x_bf = x_lane.astype(jnp.bfloat16)                           # matmul operand

    out = pl.pallas_call(
        basic_block_kernel,
        out_shape=jax.ShapeDtypeStruct((H, L), jnp.float32),
    )(x_bf, x_lane, a1, a2, b1_lane, b2_lane)

    # lane-dense (H, N*W*C) -> NCHW (glue for the PyTorch-style interface; a chain
    # of BasicBlocks would keep the lane-dense layout between blocks instead)
    return jnp.transpose(out.reshape(H, N, W, C), (1, 3, 0, 2))


def reference_forward(x_nchw, w1, w2, gamma1, beta1, mean1, var1,
                      gamma2, beta2, mean2, var2, eps=1e-5):
    """Pure-JAX f32 reference (lax.conv) for correctness check."""
    dn = ('NCHW', 'OIHW', 'NCHW')

    def bn(y, g, b, m, v):
        g = g.reshape(1, -1, 1, 1)
        b = b.reshape(1, -1, 1, 1)
        m = m.reshape(1, -1, 1, 1)
        v = v.reshape(1, -1, 1, 1)
        return g * (y - m) / jnp.sqrt(v + eps) + b

    out = jax.lax.conv_general_dilated(x_nchw, w1, (1, 1), ((1, 1), (1, 1)),
                                       dimension_numbers=dn)
    out = jnp.maximum(bn(out, gamma1, beta1, mean1, var1), 0.0)
    out = jax.lax.conv_general_dilated(out, w2, (1, 1), ((1, 1), (1, 1)),
                                       dimension_numbers=dn)
    out = bn(out, gamma2, beta2, mean2, var2) + x_nchw
    return jnp.maximum(out, 0.0)


if __name__ == "__main__":
    N, C, H, W = 2, 4, 16, 16   # inplanes == planes == 4, stride=1, downsample=None
    # N*W*C = 128 -> one full lane-width block.

    key = jax.random.PRNGKey(0)
    kx, kw1, kw2 = jax.random.split(key, 3)

    x = jax.random.normal(kx, (N, C, H, W), jnp.float32)

    # Deterministic Conv2d-style init (uniform, kaiming-like bound), bias=False
    fan_in = C * 3 * 3
    bound = 1.0 / math.sqrt(fan_in)
    w1 = jax.random.uniform(kw1, (C, C, 3, 3), jnp.float32, -bound, bound)
    w2 = jax.random.uniform(kw2, (C, C, 3, 3), jnp.float32, -bound, bound)

    # BatchNorm2d deterministic init: weight=1, bias=0, running_mean=0, running_var=1
    gamma1 = jnp.ones((C,), jnp.float32)
    beta1 = jnp.zeros((C,), jnp.float32)
    mean1 = jnp.zeros((C,), jnp.float32)
    var1 = jnp.ones((C,), jnp.float32)
    gamma2 = jnp.ones((C,), jnp.float32)
    beta2 = jnp.zeros((C,), jnp.float32)
    mean2 = jnp.zeros((C,), jnp.float32)
    var2 = jnp.ones((C,), jnp.float32)

    # Weight prep is hoisted out of the per-call path (cache for static weights).
    params = prepare_basic_block_params(w1, w2, gamma1, beta1, mean1, var1,
                                        gamma2, beta2, mean2, var2, N, W)
    params = jax.block_until_ready(params)

    out = basic_block_forward(x, params)
    out = jax.block_until_ready(out)

    ref = reference_forward(x, w1, w2, gamma1, beta1, mean1, var1,
                            gamma2, beta2, mean2, var2)
    ref = jax.block_until_ready(ref)

    assert out.shape == (N, C, H, W)
    # bf16 conv operands (f32 accumulation, f32 residual) -> loosened tolerance.
    assert jnp.allclose(out, ref, atol=5e-2, rtol=5e-2), \
        f"max abs err {jnp.max(jnp.abs(out - ref))}"
    print("KERNEL_OK")
</pallas_src>

<mosaic_0001>
module attributes {stable_mosaic.version = 11 : i64} {
  func.func @basic_block_kernel(%arg0: memref<16x128xbf16, #tpu.memory_space<vmem>>, %arg1: memref<16x128xf32, #tpu.memory_space<vmem>>, %arg2: memref<128x384xbf16, #tpu.memory_space<vmem>>, %arg3: memref<128x384xbf16, #tpu.memory_space<vmem>>, %arg4: memref<1x128xf32, #tpu.memory_space<vmem>>, %arg5: memref<1x128xf32, #tpu.memory_space<vmem>>, %arg6: memref<16x128xf32, #tpu.memory_space<vmem>>) attributes {dimension_semantics = [], scalar_prefetch = 0 : i64, scratch_operands = 0 : i64, tpu.core_type = #tpu.core_type<tc>} {
    %0 = tpu.iota {dimensions = array<i32: 0>} : vector<16x128xi32>
    %c0 = arith.constant 0 : index
    %c0_0 = arith.constant 0 : index
    %1 = vector.load %arg0[%c0, %c0_0] : memref<16x128xbf16, #tpu.memory_space<vmem>>, vector<16x128xbf16>
    %c0_1 = arith.constant 0 : index
    %c0_2 = arith.constant 0 : index
    %2 = vector.load %arg4[%c0_1, %c0_2] : memref<1x128xf32, #tpu.memory_space<vmem>>, vector<1x128xf32>
    %c0_3 = arith.constant 0 : index
    %c0_4 = arith.constant 0 : index
    %3 = vector.load %arg2[%c0_3, %c0_4] : memref<128x384xbf16, #tpu.memory_space<vmem>>, vector<128x384xbf16>
    %cst = arith.constant dense<0.000000e+00> : vector<16x384xf32>
    %4 = tpu.matmul %1, %3, %cst {dimension_numbers = #tpu.dot_dimension_numbers<[1], [0], [0], [1], [0, 0, 1, 1], [], []>} : vector<16x128xbf16>, vector<128x384xbf16>, vector<16x384xf32> -> vector<16x384xf32>
    %5 = vector.extract_strided_slice %4 {offsets = [0, 0], sizes = [16, 128], strides = [1, 1]} : vector<16x384xf32> to vector<16x128xf32>
    %6 = vector.extract_strided_slice %4 {offsets = [0, 128], sizes = [16, 128], strides = [1, 1]} : vector<16x384xf32> to vector<16x128xf32>
    %7 = vector.extract_strided_slice %4 {offsets = [0, 256], sizes = [16, 128], strides = [1, 1]} : vector<16x384xf32> to vector<16x128xf32>
    %c0_i32 = arith.constant 0 : i32
    %8 = vector.broadcast %c0_i32 : i32 to vector<16x128xi32>
    %9 = arith.cmpi eq, %0, %8 : vector<16x128xi32>
    %c1_i32 = arith.constant 1 : i32
    %10 = tpu.dynamic_rotate %5 by %c1_i32 dim 0 : vector<16x128xf32>, i32 -> vector<16x128xf32>
    %cst_5 = arith.constant 0.000000e+00 : f32
    %11 = vector.broadcast %cst_5 : f32 to vector<16x128xf32>
    %12 = arith.select %9, %11, %10 : vector<16x128xi1>, vector<16x128xf32>
    %c15_i32 = arith.constant 15 : i32
    %13 = vector.broadcast %c15_i32 : i32 to vector<16x128xi32>
    %14 = arith.cmpi eq, %0, %13 : vector<16x128xi32>
    %c15_i32_6 = arith.constant 15 : i32
    %15 = tpu.dynamic_rotate %7 by %c15_i32_6 dim 0 : vector<16x128xf32>, i32 -> vector<16x128xf32>
    %cst_7 = arith.constant 0.000000e+00 : f32
    %16 = vector.broadcast %cst_7 : f32 to vector<16x128xf32>
    %17 = arith.select %14, %16, %15 : vector<16x128xi1>, vector<16x128xf32>
    %18 = arith.addf %12, %6 : vector<16x128xf32>
    %19 = arith.addf %18, %17 : vector<16x128xf32>
    %20 = vector.broadcast %2 : vector<1x128xf32> to vector<16x128xf32>
    %21 = arith.addf %19, %20 : vector<16x128xf32>
    %cst_8 = arith.constant 0.000000e+00 : f32
    %22 = vector.broadcast %cst_8 : f32 to vector<16x128xf32>
    %23 = arith.maximumf %21, %22 : vector<16x128xf32>
    %24 = arith.truncf %23 : vector<16x128xf32> to vector<16x128xbf16>
    %c0_9 = arith.constant 0 : index
    %c0_10 = arith.constant 0 : index
    %25 = vector.load %arg5[%c0_9, %c0_10] : memref<1x128xf32, #tpu.memory_space<vmem>>, vector<1x128xf32>
    %c0_11 = arith.constant 0 : index
    %c0_12 = arith.constant 0 : index
    %26 = vector.load %arg3[%c0_11, %c0_12] : memref<128x384xbf16, #tpu.memory_space<vmem>>, vector<128x384xbf16>
    %cst_13 = arith.constant dense<0.000000e+00> : vector<16x384xf32>
    %27 = tpu.matmul %24, %26, %cst_13 {dimension_numbers = #tpu.dot_dimension_numbers<[1], [0], [0], [1], [0, 0, 1, 1], [], []>} : vector<16x128xbf16>, vector<128x384xbf16>, vector<16x384xf32> -> vector<16x384xf32>
    %28 = vector.extract_strided_slice %27 {offsets = [0, 0], sizes = [16, 128], strides = [1, 1]} : vector<16x384xf32> to vector<16x128xf32>
    %29 = vector.extract_strided_slice %27 {offsets = [0, 128], sizes = [16, 128], strides = [1, 1]} : vector<16x384xf32> to vector<16x128xf32>
    %30 = vector.extract_strided_slice %27 {offsets = [0, 256], sizes = [16, 128], strides = [1, 1]} : vector<16x384xf32> to vector<16x128xf32>
    %c0_i32_14 = arith.constant 0 : i32
    %31 = vector.broadcast %c0_i32_14 : i32 to vector<16x128xi32>
    %32 = arith.cmpi eq, %0, %31 : vector<16x128xi32>
    %c1_i32_15 = arith.constant 1 : i32
    %33 = tpu.dynamic_rotate %28 by %c1_i32_15 dim 0 : vector<16x128xf32>, i32 -> vector<16x128xf32>
    %cst_16 = arith.constant 0.000000e+00 : f32
    %34 = vector.broadcast %cst_16 : f32 to vector<16x128xf32>
    %35 = arith.select %32, %34, %33 : vector<16x128xi1>, vector<16x128xf32>
    %c15_i32_17 = arith.constant 15 : i32
    %36 = vector.broadcast %c15_i32_17 : i32 to vector<16x128xi32>
    %37 = arith.cmpi eq, %0, %36 : vector<16x128xi32>
    %c15_i32_18 = arith.constant 15 : i32
    %38 = tpu.dynamic_rotate %30 by %c15_i32_18 dim 0 : vector<16x128xf32>, i32 -> vector<16x128xf32>
    %cst_19 = arith.constant 0.000000e+00 : f32
    %39 = vector.broadcast %cst_19 : f32 to vector<16x128xf32>
    %40 = arith.select %37, %39, %38 : vector<16x128xi1>, vector<16x128xf32>
    %41 = arith.addf %35, %29 : vector<16x128xf32>
    %42 = arith.addf %41, %40 : vector<16x128xf32>
    %43 = vector.broadcast %25 : vector<1x128xf32> to vector<16x128xf32>
    %44 = arith.addf %42, %43 : vector<16x128xf32>
    %c0_20 = arith.constant 0 : index
    %c0_21 = arith.constant 0 : index
    %45 = vector.load %arg1[%c0_20, %c0_21] : memref<16x128xf32, #tpu.memory_space<vmem>>, vector<16x128xf32>
    %46 = arith.addf %44, %45 : vector<16x128xf32>
    %cst_22 = arith.constant 0.000000e+00 : f32
    %47 = vector.broadcast %cst_22 : f32 to vector<16x128xf32>
    %48 = arith.maximumf %46, %47 : vector<16x128xf32>
    %c0_23 = arith.constant 0 : index
    %c0_24 = arith.constant 0 : index
    %49 = vector.load %arg6[%c0_23, %c0_24] : memref<16x128xf32, #tpu.memory_space<vmem>>, vector<16x128xf32>
    tpu.vector_store %arg6[%c0_23, %c0_24], %48 {strides = array<i32>} : memref<16x128xf32, #tpu.memory_space<vmem>>, vector<16x128xf32>,
    return
  }
}

</mosaic_0001>

<bundles_post_ra>
// kernel: tpu_custom_call.1
= control target key start
LH: loop header
LB: loop body
LE: loop exit
PB: predicated region body
PF: predicated region fallthrough
CT: control target
= control target key end

     0   :  { %11 = vsyncpa [#allocation3], 0  ;;  %s1071_s0 = inlined_call_operand.hbm [shape: bf16[16,128], index: 0, kind: input, shape index: {}]   ;;  %s1072_s1 = inlined_call_operand.hbm [shape: f32[16,128], index: 1, kind: input, shape index: {}]   ;;  %s1073_s2 = inlined_call_operand.hbm [shape: bf16[128,384], index: 2, kind: input, shape index: {}]   ;;  %s1074_s3 = inlined_call_operand.hbm [shape: bf16[128,384], index: 3, kind: input, shape index: {}]   ;;  %s1075_s4 = inlined_call_operand.vmem [shape: f32[1,128], index: 4, kind: input, shape index: {}]   ;;  %s1076_s5 = inlined_call_operand.vmem [shape: f32[1,128], index: 5, kind: input, shape index: {}]   ;;  %s1077_s6 = inlined_call_operand.hbm [shape: f32[16,128], index: 6, kind: output, shape index: {}]  }
   0x1   :  { %12 = vsyncpa [#allocation6], 0 }
   0x2   :  { %13 = vsyncpa [#allocation9], 0 }
   0x3   :  { %14 = vsyncpa [#allocation4], 0  ;;  %s961_s21 = smov [#allocation5]  }
   0x4   :  { %s32_s22 = sshll.u32 %s961_s21, 4  ;;  %s33_s22 = int_to_ptr.vmem [resolvable:$true] %s32_s22 }
   0x5   :  { %s861_s23 = scalar_lea.vmem %s33_s22, 256  ;;  %p866_p1 = scmp.lt.s32.totalorder %s33_s22, %s33_s22 }
   0x6   :  { %p862_p0 = scmp.ne.s32.totalorder %s33_s22, %s861_s23  ;;  %p867_p2 = scmp.lt.s32.totalorder %s861_s23, %s861_s23 }
   0x8   :  { %p868_p3 = por %p867_p2, %p866_p1 }
   0xa   :  { %p869_p4 = pnand %p868_p3, %p862_p0 }
   0xc   :  { %872 = shalt.err (!%p869_p4)
}
   0xd   :  { %s962_s24 = smov 128   ;;  %s963_s25 = smov 8  }
   0xe   :  { %38 = dma.hbm_to_vmem [thread:$0]  %s1072_s1, 256, %s33_s22, [#allocation6], %s962_s24, %s962_s24, %s963_s25  }
   0xf   :  { %s964_s28 = smov [#allocation2]  }
  0x10   :  { %s20_s29 = sshll.u32 %s964_s28, 4  ;;  %s21_s29 = int_to_ptr.vmem [resolvable:$true] %s20_s29 }
  0x11   :  { %s881_s30 = scalar_lea.vmem %s21_s29, 128  ;;  %p886_p6 = scmp.lt.s32.totalorder %s21_s29, %s21_s29 }
  0x12   :  { %p882_p5 = scmp.ne.s32.totalorder %s21_s29, %s881_s30  ;;  %p887_p7 = scmp.lt.s32.totalorder %s881_s30, %s881_s30 }
  0x14   :  { %p888_p8 = por %p887_p7, %p886_p6 }
  0x16   :  { %p889_p9 = pnand %p888_p8, %p882_p5 }
  0x18   :  { %892 = shalt.err (!%p889_p9)
}
  0x19   :  { %s965_s7 = smov 64   ;;  %s966_s8 = smov 4  }
  0x1a   :  { %26 = dma.hbm_to_vmem [thread:$0]  %s1071_s0, 128, %s21_s29, [#allocation3], %s965_s7, %s965_s7, %s966_s8  }
  0x1b   :  { %s967_s11 = smov [#allocation7]  }
  0x1c   :  { %s44_s12 = sshll.u32 %s967_s11, 4  ;;  %s45_s12 = int_to_ptr.vmem [resolvable:$true] %s44_s12 }
  0x1d   :  { %s901_s1 = scalar_lea.vmem %s45_s12, 3072  ;;  %p906_p11 = scmp.lt.s32.totalorder %s45_s12, %s45_s12 }
  0x1e   :  { %p902_p10 = scmp.ne.s32.totalorder %s45_s12, %s901_s1  ;;  %p907_p12 = scmp.lt.s32.totalorder %s901_s1, %s901_s1 }
  0x20   :  { %p908_p13 = por %p907_p12, %p906_p11 }
  0x22   :  { %p909_p0 = pnand %p908_p13, %p902_p10 }
  0x24   :  { %912 = shalt.err (!%p909_p0)
}
  0x25   :  { %s968_s13 = smov 192   ;;  %s969_s14 = smov 12  }
  0x26   :  { %50 = dma.hbm_to_vmem [thread:$0]  %s1073_s2, 3072, %s45_s12, [#allocation6], %s968_s13, %s968_s13, %s969_s14  }
  0x27   :  { %s970_s17 = smov [#allocation8]  }
  0x28   :  { %s56_s18 = sshll.u32 %s970_s17, 4  ;;  %s57_s18 = int_to_ptr.vmem [resolvable:$true] %s56_s18 }
  0x29   :  { %s921_s0 = scalar_lea.vmem %s57_s18, 3072  ;;  %p926_p2 = scmp.lt.s32.totalorder %s57_s18, %s57_s18 }
  0x2a   :  { %p922_p1 = scmp.ne.s32.totalorder %s57_s18, %s921_s0  ;;  %p927_p3 = scmp.lt.s32.totalorder %s921_s0, %s921_s0 }
  0x2c   :  { %p928_p4 = por %p927_p3, %p926_p2 }
  0x2e   :  { %p929_p5 = pnand %p928_p4, %p922_p1 }
  0x30   :  { %932 = shalt.err (!%p929_p5)
}
  0x31   :  { %62 = dma.hbm_to_vmem [thread:$0]  %s1074_s3, 3072, %s57_s18, [#allocation9], %s968_s13, %s968_s13, %s969_s14  }
  0x32   :  { %953 = dma.done.wait [#allocation3], 128  }
  0x33   :  { %954 = vsyncadd [#allocation3], 4294967168 }
  0x34   :  { %955 = dma.done.wait [#allocation6], 3328  }
  0x35   :  { %956 = vsyncadd [#allocation6], 4294963968 }
  0x36   :  { %957 = dma.done.wait [#allocation9], 3072  }
  0x37   :  { %958 = vsyncadd [#allocation9], 4294964224  ;;  %v971_v0 = vmov 0.0   ;;  %vm972_vm0 = vmmov 0   ;;  %v973_v1 = vmov 0   ;;  %v820_v27 = vld [vmem:[#allocation2] sm:$0xff]   ;;  %v80_v51 = vlaneseq }
  0x38   :  { %734 = vmatprep.subr.bf16.mxu1 %v971_v0  ;;  %750 = vmatprep.mubr.msk.bf16.mxu1 %vm972_vm0, %v971_v0  ;;  %v788_v2 = vld [vmem:[#allocation7 + $0xac] ss:$12 sps:$4 sm:$0xff]   ;;  %v790_v3 = vld [vmem:[#allocation7 + $0xb0] ss:$12 sps:$4 sm:$0xff]   ;;  %v791_v4 = vld [vmem:[#allocation7 + $0xa8] ss:$12 sps:$4 sm:$0xff]  }
  0x39   :  { %284 = vmatprep.mubr.bf16.mxu0 %v973_v1  ;;  %252 = vmatprep.subr.bf16.mxu0 %v788_v2  ;;  %v792_v5 = vld [vmem:[#allocation7 + $0x94] ss:$12 sps:$4 sm:$0xff]   ;;  %v794_v6 = vld [vmem:[#allocation7 + $0x98] ss:$12 sps:$4 sm:$0xff]   ;;  %v795_v7 = vld [vmem:[#allocation7 + $0x90] ss:$12 sps:$4 sm:$0xff]  }
  0x3a   :  { %735 = vmatpush3.bf16.msra.mxu1 %v790_v3  ;;  %253 = vmatpush1.bf16.msra.mxu0 %v791_v4  ;;  %v796_v8 = vld [vmem:[#allocation7 + $0x7c] ss:$12 sps:$4 sm:$0xff]   ;;  %v798_v9 = vld [vmem:[#allocation7 + $0x80] ss:$12 sps:$4 sm:$0xff]   ;;  %v799_v10 = vld [vmem:[#allocation7 + $0x78] ss:$12 sps:$4 sm:$0xff]  }
  0x3b   :  { %736 = vmatprep.subr.bf16.mxu1 %v971_v0  ;;  %254 = vmatprep.subr.bf16.mxu0 %v792_v5  ;;  %v800_v11 = vld [vmem:[#allocation7 + $0x64] ss:$12 sps:$4 sm:$0xff]   ;;  %v802_v12 = vld [vmem:[#allocation7 + $0x68] ss:$12 sps:$4 sm:$0xff]   ;;  %v803_v13 = vld [vmem:[#allocation7 + $0x60] ss:$12 sps:$4 sm:$0xff]  }
  0x3c   :  { %v804_v14 = vld [vmem:[#allocation7 + $0x4c] ss:$12 sps:$4 sm:$0xff]   ;;  %v806_v15 = vld [vmem:[#allocation7 + $0x50] ss:$12 sps:$4 sm:$0xff]   ;;  %v807_v16 = vld [vmem:[#allocation7 + $0x48] ss:$12 sps:$4 sm:$0xff]  }
  0x3d   :  { %v808_v17 = vld [vmem:[#allocation7 + $0x34] ss:$12 sps:$4 sm:$0xff]   ;;  %v810_v18 = vld [vmem:[#allocation7 + $0x38] ss:$12 sps:$4 sm:$0xff]   ;;  %v811_v19 = vld [vmem:[#allocation7 + $0x30] ss:$12 sps:$4 sm:$0xff]  }
  0x3e   :  { %737 = vmatpush3.bf16.msra.mxu1 %v794_v6  ;;  %255 = vmatpush1.bf16.msra.mxu0 %v795_v7  ;;  %v812_v20 = vld [vmem:[#allocation7 + $0x1c] ss:$12 sps:$4 sm:$0xff]   ;;  %v814_v21 = vld [vmem:[#allocation7 + $0x20] ss:$12 sps:$4 sm:$0xff]   ;;  %v815_v22 = vld [vmem:[#allocation7 + $0x18] ss:$12 sps:$4 sm:$0xff]  }
  0x3f   :  { %738 = vmatprep.subr.bf16.mxu1 %v971_v0  ;;  %256 = vmatprep.subr.bf16.mxu0 %v796_v8  ;;  %v816_v23 = vld [vmem:[#allocation7 + $0x4] ss:$12 sps:$4 sm:$0xff]   ;;  %v818_v24 = vld [vmem:[#allocation7 + $0x8] ss:$12 sps:$4 sm:$0xff]   ;;  %v819_v25 = vld [vmem:[#allocation7] ss:$12 sps:$4 sm:$0xff]  }
  0x40   :  { %v823_v26 = vld [vmem:[#allocation8 + $0xac] ss:$12 sps:$4 sm:$0xff]   ;;  %v824_v28 = vld [vmem:[#allocation8 + $0xb0] ss:$12 sps:$4 sm:$0xff]   ;;  %v821_v29 = vld [vmem:[#allocation8 + $0xa8] ss:$12 sps:$4 sm:$0xff]  }
  0x41   :  { %v827_v30 = vld [vmem:[#allocation8 + $0x94] ss:$12 sps:$4 sm:$0xff]   ;;  %v828_v31 = vld [vmem:[#allocation8 + $0x98] ss:$12 sps:$4 sm:$0xff]   ;;  %v825_v32 = vld [vmem:[#allocation8 + $0x90] ss:$12 sps:$4 sm:$0xff]  }
  0x42   :  { %739 = vmatpush3.bf16.msra.mxu1 %v798_v9  ;;  %257 = vmatpush1.bf16.msra.mxu0 %v799_v10  ;;  %v831_v33 = vld [vmem:[#allocation8 + $0x7c] ss:$12 sps:$4 sm:$0xff]   ;;  %v832_v34 = vld [vmem:[#allocation8 + $0x80] ss:$12 sps:$4 sm:$0xff]   ;;  %v829_v35 = vld [vmem:[#allocation8 + $0x78] ss:$12 sps:$4 sm:$0xff]  }
  0x43   :  { %740 = vmatprep.subr.bf16.mxu1 %v971_v0  ;;  %258 = vmatprep.subr.bf16.mxu0 %v800_v11  ;;  %v835_v36 = vld [vmem:[#allocation8 + $0x64] ss:$12 sps:$4 sm:$0xff]   ;;  %v833_v37 = vld [vmem:[#allocation8 + $0x60] ss:$12 sps:$4 sm:$0xff]   ;;  %v836_v38 = vld [vmem:[#allocation8 + $0x68] ss:$12 sps:$4 sm:$0xff]  }
  0x44   :  { %v839_v39 = vld [vmem:[#allocation8 + $0x4c] ss:$12 sps:$4 sm:$0xff]   ;;  %v837_v40 = vld [vmem:[#allocation8 + $0x48] ss:$12 sps:$4 sm:$0xff]   ;;  %v840_v41 = vld [vmem:[#allocation8 + $0x50] ss:$12 sps:$4 sm:$0xff]  }
  0x45   :  { %v843_v42 = vld [vmem:[#allocation8 + $0x34] ss:$12 sps:$4 sm:$0xff]   ;;  %v841_v43 = vld [vmem:[#allocation8 + $0x30] ss:$12 sps:$4 sm:$0xff]   ;;  %v844_v44 = vld [vmem:[#allocation8 + $0x38] ss:$12 sps:$4 sm:$0xff]  }
  0x46   :  { %741 = vmatpush3.bf16.msra.mxu1 %v802_v12  ;;  %259 = vmatpush1.bf16.msra.mxu0 %v803_v13  ;;  %v847_v45 = vld [vmem:[#allocation8 + $0x1c] ss:$12 sps:$4 sm:$0xff]   ;;  %v845_v46 = vld [vmem:[#allocation8 + $0x18] ss:$12 sps:$4 sm:$0xff]   ;;  %v848_v47 = vld [vmem:[#allocation8 + $0x20] ss:$12 sps:$4 sm:$0xff]  }
  0x47   :  { %742 = vmatprep.subr.bf16.mxu1 %v971_v0  ;;  %260 = vmatprep.subr.bf16.mxu0 %v804_v14  ;;  %v851_v48 = vld [vmem:[#allocation8 + $0x4] ss:$12 sps:$4 sm:$0xff]   ;;  %v849_v49 = vld [vmem:[#allocation8] ss:$12 sps:$4 sm:$0xff]   ;;  %v852_v50 = vld [vmem:[#allocation8 + $0x8] ss:$12 sps:$4 sm:$0xff]  }
  0x48   :  { %v81_v52 = vshrl.u32 %v80_v51, 7  ;;  %v690_v8 = vld [vmem:[%s1075_s4] ss:$0 sm:$0xff]  ;;  %s974_s22 = smov [#allocation10]  }
  0x49   :  { %s651_s23 = sshll.u32 %s974_s22, 4  ;;  %s652_s23 = int_to_ptr.vmem [resolvable:$true] %s651_s23 }
  0x4a   :  { %743 = vmatpush3.bf16.msra.mxu1 %v806_v15  ;;  %261 = vmatpush1.bf16.msra.mxu0 %v807_v16  ;;  %v82_v58 = vadd.s32 8, %v81_v52  ;;  %vm349_vm1 = vcmp.lt.s32.totalorder %v81_v52, 7  ;;  %vm340_vm2 = vcmp.lt.s32.totalorder %v81_v52, 1  ;;  %vm336_vm3 = vcmp.eq.s32.totalorder %v81_v52, 0  ;;  %s933_s26 = scalar_lea.vmem %s652_s23, 256  ;;  %p938_p7 = scmp.lt.s32.totalorder %s652_s23, %s652_s23 }
  0x4b   :  { %744 = vmatprep.subr.bf16.mxu1 %v971_v0  ;;  %262 = vmatprep.subr.bf16.mxu0 %v808_v17  ;;  %p934_p6 = scmp.ne.s32.totalorder %s652_s23, %s933_s26  ;;  %p939_p8 = scmp.lt.s32.totalorder %s933_s26, %s933_s26 }
  0x4c   :  { %vm346_vm4 = vcmp.eq.s32.totalorder %v82_v58, 15 }
  0x4d   :  { %p940_p9 = por %p939_p8, %p938_p7 }
  0x4e   :  { %745 = vmatpush3.bf16.msra.mxu1 %v810_v18  ;;  %263 = vmatpush1.bf16.msra.mxu0 %v811_v19 }
  0x4f   :  { %746 = vmatprep.subr.bf16.mxu1 %v971_v0  ;;  %264 = vmatprep.subr.bf16.mxu0 %v812_v20  ;;  %p941_p10 = pnand %p940_p9, %p934_p6 }
  0x52   :  { %747 = vmatpush3.bf16.msra.mxu1 %v814_v21  ;;  %265 = vmatpush1.bf16.msra.mxu0 %v815_v22 }
  0x53   :  { %748 = vmatprep.subr.bf16.mxu1 %v971_v0  ;;  %266 = vmatprep.subr.bf16.mxu0 %v816_v23 }
  0x56   :  { %749 = vmatpush3.bf16.msra.mxu1 %v818_v24  ;;  %267 = vmatpush1.bf16.msra.mxu0 %v819_v25 }
  0x57   :  { %754 = vmatprep.subr.bf16.mxu1 %v971_v0  ;;  %530 = vmatprep.subr.bf16.mxu0 %v823_v26 }
  0x59   :  { %751 = vmatmul.mubr.bf16.vlgmr.msra.gmra.mxu1 %v820_v27  ;;  %285 = vmatmul.mubr.bf16.vlgmr.msra.gmra.mxu0 %v820_v27 }
  0x5a   :  { %755 = vmatpush3.bf16.msra.mxu1 %v824_v28  ;;  %531 = vmatpush1.bf16.msra.mxu0 %v821_v29 }
  0x5b   :  { %756 = vmatprep.subr.bf16.mxu1 %v971_v0  ;;  %532 = vmatprep.subr.bf16.mxu0 %v827_v30 }
  0x5c   :  { %562 = vmatprep.mubr.bf16.mxu0 %v973_v1  ;;  %770 = vmatprep.mubr.msk.bf16.mxu1 %vm972_vm0, %v971_v0 }
  0x5e   :  { %757 = vmatpush3.bf16.msra.mxu1 %v828_v31  ;;  %533 = vmatpush1.bf16.msra.mxu0 %v825_v32 }
  0x5f   :  { %758 = vmatprep.subr.bf16.mxu1 %v971_v0  ;;  %534 = vmatprep.subr.bf16.mxu0 %v831_v33 }
  0x62   :  { %759 = vmatpush3.bf16.msra.mxu1 %v832_v34  ;;  %535 = vmatpush1.bf16.msra.mxu0 %v829_v35 }
  0x63   :  { %760 = vmatprep.subr.bf16.mxu1 %v971_v0  ;;  %536 = vmatprep.subr.bf16.mxu0 %v835_v36 }
  0x66   :  { %537 = vmatpush1.bf16.msra.mxu0 %v833_v37  ;;  %761 = vmatpush3.bf16.msra.mxu1 %v836_v38  ;;  %v715_v37 = vld [vmem:[%s1076_s5] ss:$0 sm:$0xff] }
  0x67   :  { %762 = vmatprep.subr.bf16.mxu1 %v971_v0  ;;  %538 = vmatprep.subr.bf16.mxu0 %v839_v39 }
  0x6a   :  { %539 = vmatpush1.bf16.msra.mxu0 %v837_v40  ;;  %763 = vmatpush3.bf16.msra.mxu1 %v840_v41  ;;  %v639_v41 = vld [vmem:[#allocation5 + $0x8] sm:$0xff] }
  0x6b   :  { %764 = vmatprep.subr.bf16.mxu1 %v971_v0  ;;  %540 = vmatprep.subr.bf16.mxu0 %v843_v42 }
  0x6e   :  { %541 = vmatpush1.bf16.msra.mxu0 %v841_v43  ;;  %765 = vmatpush3.bf16.msra.mxu1 %v844_v44  ;;  %v638_v43 = vld [vmem:[#allocation5] sm:$0xff] }
  0x6f   :  { %766 = vmatprep.subr.bf16.mxu1 %v971_v0  ;;  %542 = vmatprep.subr.bf16.mxu0 %v847_v45 }
  0x72   :  { %543 = vmatpush1.bf16.msra.mxu0 %v845_v46  ;;  %767 = vmatpush3.bf16.msra.mxu1 %v848_v47 }
  0x73   :  { %768 = vmatprep.subr.bf16.mxu1 %v971_v0  ;;  %544 = vmatprep.subr.bf16.mxu0 %v851_v48 }
  0x76   :  { %545 = vmatpush1.bf16.msra.mxu0 %v849_v49  ;;  %769 = vmatpush3.bf16.msra.mxu1 %v852_v50 }
 0x119   :  { %v329_v53 = vpop.f32.mrf.mxu1  ;;  %v286_v54 = vpop.f32.mrf.mxu0 }
 0x11a   :  { %v347_v56 = vrot.slane %v329_v53, 1  ;;  %v338_v62 = vrot.slane %v286_v54, 7 }
 0x11b   :  { %v752_v55 = vpop.f32.mrf.mxu1  ;;  %v288_v57 = vpop.f32.mrf.mxu0 }
 0x11d   :  { %v332_v59 = vpop.f32.mrf.mxu1  ;;  %v290_v61 = vpop.f32.mrf.mxu0 }
 0x11e   :  { %v348_v60 = vrot.slane %v332_v59, 1  ;;  %v339_v63 = vrot.slane %v290_v61, 7 }
 0x11f   :  { %v753_v0 = vpop.f32.mrf.mxu1  ;;  %v292_v1 = vpop.f32.mrf.mxu0 }
 0x120   :  { %v351_v2 = vsel %vm349_vm1, %v348_v60, %v347_v56  ;;  %v342_v3 = vsel %vm340_vm2, %v339_v63, %v338_v62  ;;  %v341_v4 = vsel %vm340_vm2, %v338_v62, %v339_v63  ;;  %v350_v10 = vsel %vm349_vm1, %v347_v56, %v348_v60 }
 0x121   :  { %v343_v5 = vsel %vm336_vm3, 0.0, %v342_v3  ;;  %v355_v6 = vadd.f32 %v341_v4, %v292_v1  ;;  %v353_v9 = vsel %vm346_vm4, 0.0, %v351_v2 }
 0x122   :  { %v354_v7 = vadd.f32 %v343_v5, %v288_v57 }
 0x123   :  { %v357_v11 = vadd.f32 %v355_v6, %v353_v9 }
 0x124   :  { %v356_v12 = vadd.f32 %v354_v7, %v350_v10 }
 0x125   :  { %v365_v13 = vadd.f32 %v690_v8, %v357_v11 }
 0x126   :  { %v364_v14 = vadd.f32 %v690_v8, %v356_v12 }
 0x127   :  { %v367_v15 = vmax.f32 %v365_v13, 0.0 }
 0x128   :  { %v366_v16 = vmax.f32 %v364_v14, 0.0 }
 0x12a   :  { %v368_v17 = vpack.c.bf16 %v367_v15, %v366_v16 }
 0x12c   :  { %563 = vmatmul.mubr.bf16.vlgmr.msra.gmra.mxu0 %v368_v17  ;;  %771 = vmatmul.mubr.bf16.vlgmr.msra.gmra.mxu1 %v368_v17 }
 0x1ec   :  { %v564_v18 = vpop.f32.mrf.mxu0  ;;  %v607_v19 = vpop.f32.mrf.mxu1 }
 0x1ed   :  { %v614_v24 = vrot.slane %v564_v18, 7  ;;  %v620_v25 = vrot.slane %v607_v19, 1 }
 0x1ee   :  { %v566_v20 = vpop.f32.mrf.mxu0  ;;  %v772_v21 = vpop.f32.mrf.mxu1 }
 0x1f0   :  { %v568_v22 = vpop.f32.mrf.mxu0  ;;  %v610_v23 = vpop.f32.mrf.mxu1 }
 0x1f1   :  { %v615_v26 = vrot.slane %v568_v22, 7  ;;  %v621_v27 = vrot.slane %v610_v23, 1 }
 0x1f2   :  { %v570_v28 = vpop.f32.mrf.mxu0  ;;  %v773_v29 = vpop.f32.mrf.mxu1 }
 0x1f3   :  { %v617_v30 = vsel %vm340_vm2, %v615_v26, %v614_v24  ;;  %v616_v31 = vsel %vm340_vm2, %v614_v24, %v615_v26  ;;  %v623_v32 = vsel %vm349_vm1, %v621_v27, %v620_v25  ;;  %v622_v38 = vsel %vm349_vm1, %v620_v25, %v621_v27 }
 0x1f4   :  { %v618_v33 = vsel %vm336_vm3, 0.0, %v617_v30  ;;  %v625_v34 = vsel %vm346_vm4, 0.0, %v623_v32  ;;  %v627_v35 = vadd.f32 %v616_v31, %v570_v28 }
 0x1f5   :  { %v626_v36 = vadd.f32 %v618_v33, %v566_v20 }
 0x1f6   :  { %v629_v39 = vadd.f32 %v627_v35, %v625_v34 }
 0x1f7   :  { %v628_v40 = vadd.f32 %v626_v36, %v622_v38 }
 0x1f8   :  { %v637_v42 = vadd.f32 %v715_v37, %v629_v39 }
 0x1f9   :  { %v636_v44 = vadd.f32 %v715_v37, %v628_v40 }
 0x1fa   :  { %v641_v45 = vadd.f32 %v639_v41, %v637_v42 }
 0x1fb   :  { %v640_v46 = vadd.f32 %v638_v43, %v636_v44 }
 0x1fc   :  { %v643_v47 = vmax.f32 %v641_v45, 0.0 }
 0x1fd   :  { %v642_v48 = vmax.f32 %v640_v46, 0.0 }
 0x1fe   :  { %645 = vst [vmem:[#allocation10 + $0x8] sm:$0xff] %v643_v47 }
 0x1ff   :  { %644 = vst [vmem:[#allocation10] sm:$0xff] %v642_v48 }
 0x200   :  { %944 = shalt.err (!%p941_p10)
}
 0x201   :  { %657 = dma.vmem_to_hbm [thread:$0]  %s652_s23, 256, %s1077_s6, [#allocation4], %s962_s24, %s962_s24, %s963_s25  }
 0x202   :  { %959 = dma.done.wait [#allocation4], 256  }
 0x203   :  { %960 = vsyncadd [#allocation4], 4294967040 }
 0x204   :  { %661 = vsyncpa [#allocation3], 1 }
 0x205   :  { %662 = vsyncpa [#allocation6], 1 }
 0x206   :  { %663 = vsyncpa [#allocation9], 1 }
 0x207   :  { %664 = vsyncpa [#allocation4], 1 }

</bundles_post_ra>
